<compile_context>
chip_gen: v6e
topology: v6e:2x2x1
jax: 0.10.0
libtpu: 0.0.40
codegen_flags: <defaults>
</compile_context>

<pallas_src>
import functools

import jax
import jax.numpy as jnp
from jax import lax
from jax.experimental import pallas as pl
from jax.experimental.pallas import tpu as pltpu


_VMEM_LIMIT_BYTES = 48 * 1024 * 1024   # safe on v7x (64 MiB phys), ample on v5e/v6e
_TARGET_BLOCK_BYTES = 4 * 1024 * 1024  # ~4 MiB/block; 2 bufs x (in+out) ~= 16-17 MiB


def _splitmix_bits(idx_u32, seed_u32):
    """Counter-based 32-bit hash (lowbias32 finalizer). Pure integer VPU ops,
    so it lowers on the TPU backend *and* the CPU interpreter (unlike
    pltpu.prng_seed / prng_random_bits)."""
    x = idx_u32 ^ (seed_u32 * jnp.uint32(0x9E3779B1))
    x = x ^ (x >> 16)
    x = x * jnp.uint32(0x7FEB352D)
    x = x ^ (x >> 15)
    x = x * jnp.uint32(0x846CA68B)
    x = x ^ (x >> 16)
    return x


def _make_kernel(apply_dropout: bool, dropout_p: float, tb: int, tc: int, d2: int):
    """Builds the tile kernel: out = dropout(x + pe)."""
    if apply_dropout:
        # keep iff top-31 bits >= thresh  =>  P(keep) = 1 - p  (inverted dropout)
        thresh31 = min(int(round(dropout_p * (2.0 ** 31))), 2 ** 31 - 1)
        inv_keep = 1.0 / (1.0 - dropout_p)

        def kernel(seed_ref, x_ref, pe_ref, o_ref):
            # x_ref: (tb, tc)   pe_ref: (1, tc)   o_ref: (tb, tc)
            y = x_ref[...] + pe_ref[...]          # pe broadcasts across sublanes

            # Global element coordinates of this block -> stateless PRNG stream.
            row_off = (pl.program_id(0) * tb).astype(jnp.uint32)
            col_off = (pl.program_id(1) * tc).astype(jnp.uint32)
            rows = lax.broadcasted_iota(jnp.int32, y.shape, 0).astype(jnp.uint32) + row_off
            cols = lax.broadcasted_iota(jnp.int32, y.shape, 1).astype(jnp.uint32) + col_off
            idx = rows * jnp.uint32(d2) + cols
            bits = _splitmix_bits(idx, seed_ref[0].astype(jnp.uint32))
            # Compare on the top 31 bits as signed int32: correct for any
            # dropout_p (incl. > 0.5) regardless of signed/unsigned lowering.
            keep = (bits >> 1).astype(jnp.int32) >= jnp.int32(thresh31)

            zeros = jnp.zeros_like(y)
            if y.dtype == jnp.float32:
                y = jnp.where(keep, y * jnp.float32(inv_keep), zeros)
            else:
                # Scale in f32 so 1/(1-p) is not pre-rounded to bf16/fp8.
                y = jnp.where(
                    keep,
                    (y.astype(jnp.float32) * jnp.float32(inv_keep)).astype(y.dtype),
                    zeros,
                )
            o_ref[...] = y.astype(o_ref.dtype)

        return kernel

    def kernel(x_ref, pe_ref, o_ref):
        o_ref[...] = (x_ref[...] + pe_ref[...]).astype(o_ref.dtype)

    return kernel


def _choose_tiles(num_rows: int, num_cols: int, itemsize: int):
    """Pick (row_tile, col_tile) targeting ~4 MiB blocks.

    Row tile is aligned to the packed sublane count of the dtype (8 f32 /
    16 bf16 / 32 int8).  If even a minimal-row slab of full rows blows the
    block budget, the lane axis is blocked in multiples of 128 instead.
    Small inputs are split into >=2 row steps so the parallel grid can shard
    across both v7x TensorCores.
    """
    if itemsize >= 4:
        row_align = 8
    elif itemsize == 2:
        row_align = 16
    else:
        row_align = 32

    row_bytes = num_cols * itemsize
    if row_align * row_bytes > _TARGET_BLOCK_BYTES and num_cols > 128:
        # Lane-axis split: minimal row tile, columns in multiples of 128.
        tc = (_TARGET_BLOCK_BYTES // (row_align * itemsize)) // 128 * 128
        tc = int(max(128, min(tc, num_cols)))
        tb = int(min(row_align, num_rows))
        return tb, tc

    tc = num_cols
    tb = _TARGET_BLOCK_BYTES // max(row_bytes, 1)
    if tb >= num_rows:
        tb = num_rows
        # Prefer >= 2 grid steps (v7x has 2 TensorCores) when the whole input
        # would otherwise be a single block.
        if num_rows >= 2 * row_align:
            half = -(-num_rows // 2)
            tb = ((half + row_align - 1) // row_align) * row_align
            tb = min(tb, num_rows)
    else:
        tb = max(row_align, (tb // row_align) * row_align)
        tb = min(tb, num_rows)
    return int(tb), int(tc)


@functools.partial(
    jax.jit, static_argnames=("training", "dropout_p", "donate_x")
)
def positional_encoding_forward(
    x, pe, index=None, *, training=False, dropout_p=0.1, seed=0, donate_x=False
):
    """Pallas forward for PositionalEncoding.

    Args:
      x:     [B, N, L_P, d] array.
      pe:    [max_len, d] learnable positional-encoding table.
      index: optional int array of shape [L_P] selecting pe rows.
    Returns:
      [B, N, L_P, d] array, same dtype as x.
    """
    B, N, L_P, d = x.shape
    BN = B * N
    D2 = L_P * d

    apply_dropout = bool(training) and float(dropout_p) > 0.0

    # Lane-dense 2D slab: last dim collapses (L_P, d) -> L_P*d.
    x2 = x.reshape(BN, D2)

    # Glue: row-select the pe table (pe[:L_P] or pe[index]) and flatten.
    pe_rows = pe[:L_P, :] if index is None else pe[index, :]
    pe_flat = pe_rows.astype(x.dtype).reshape(1, D2)

    # Keep output stores full-lane: pad lane axis to a 128-multiple if needed.
    D2_pad = D2 if D2 % 128 == 0 else ((D2 + 127) // 128) * 128
    if D2_pad != D2:
        x2 = jnp.pad(x2, ((0, 0), (0, D2_pad - D2)))
        pe_flat = jnp.pad(pe_flat, ((0, 0), (0, D2_pad - D2)))

    tb, tc = _choose_tiles(BN, D2_pad, x.dtype.itemsize)
    grid = (pl.cdiv(BN, tb), pl.cdiv(D2_pad, tc))

    kernel = _make_kernel(apply_dropout, float(dropout_p), tb, tc, D2_pad)

    cost = pl.CostEstimate(
        flops=BN * D2_pad,
        transcendentals=0,
        bytes_accessed=2 * BN * D2_pad * x.dtype.itemsize
        + D2_pad * x.dtype.itemsize,
    )
    compiler_params = pltpu.CompilerParams(
        dimension_semantics=("parallel", "parallel"),
        vmem_limit_bytes=_VMEM_LIMIT_BYTES,
    )
    out_shape = jax.ShapeDtypeStruct((BN, D2_pad), x.dtype)

    if apply_dropout:
        seed_arr = jnp.asarray([seed], dtype=jnp.int32)
        grid_spec = pltpu.PrefetchScalarGridSpec(
            num_scalar_prefetch=1,
            grid=grid,
            in_specs=[
                pl.BlockSpec((tb, tc), lambda i, j, s: (i, j)),
                pl.BlockSpec((1, tc), lambda i, j, s: (0, j)),   # resident pe row-block
            ],
            out_specs=pl.BlockSpec((tb, tc), lambda i, j, s: (i, j)),
        )
        io_aliases = {1: 0} if donate_x else {}
        out2 = pl.pallas_call(
            kernel,
            out_shape=out_shape,
            grid_spec=grid_spec,
            compiler_params=compiler_params,
            cost_estimate=cost,
            input_output_aliases=io_aliases,
        )(seed_arr, x2, pe_flat)
    else:
        # Eval path: no dropout -> no seed operand, no scalar-prefetch DMA.
        grid_spec = pltpu.PrefetchScalarGridSpec(
            num_scalar_prefetch=0,
            grid=grid,
            in_specs=[
                pl.BlockSpec((tb, tc), lambda i, j: (i, j)),
                pl.BlockSpec((1, tc), lambda i, j: (0, j)),
            ],
            out_specs=pl.BlockSpec((tb, tc), lambda i, j: (i, j)),
        )
        io_aliases = {0: 0} if donate_x else {}
        out2 = pl.pallas_call(
            kernel,
            out_shape=out_shape,
            grid_spec=grid_spec,
            compiler_params=compiler_params,
            cost_estimate=cost,
            input_output_aliases=io_aliases,
        )(x2, pe_flat)

    if D2_pad != D2:
        out2 = out2[:, :D2]
    return out2.reshape(B, N, L_P, d)


if __name__ == "__main__":
    # Small shapes consistent with the module's [B, N, L/P, d] forward.
    B, N, L_P, d = 2, 4, 8, 32
    max_len = 1000

    key = jax.random.PRNGKey(0)
    k_x, k_pe, k_idx = jax.random.split(key, 3)

    x = jax.random.normal(k_x, (B, N, L_P, d), dtype=jnp.float32)
    # matches nn.init.uniform_(pe, -0.02, 0.02)
    pe = jax.random.uniform(
        k_pe, (max_len, d), dtype=jnp.float32, minval=-0.02, maxval=0.02
    )

    # --- index=None path (eval mode: dropout is identity) ---
    out = positional_encoding_forward(x, pe, index=None, training=False)
    out = jax.block_until_ready(out)
    ref = x + pe[:L_P, :][None, None, :, :]
    assert out.shape == (B, N, L_P, d)
    assert jnp.allclose(out, ref, atol=1e-6), "mismatch on index=None path"

    # --- explicit index path ---
    index = jax.random.randint(k_idx, (L_P,), 0, max_len, dtype=jnp.int32)
    out_idx = positional_encoding_forward(x, pe, index=index, training=False)
    out_idx = jax.block_until_ready(out_idx)
    ref_idx = x + pe[index, :][None, None, :, :]
    assert jnp.allclose(out_idx, ref_idx, atol=1e-6), "mismatch on index path"

    # --- training path (dropout active): check shape + zero/scale structure ---
    # TODO(synk): dropout RNG stream differs from PyTorch's (hash-based PRNG).
    for p in (0.1, 0.75):
        out_tr = positional_encoding_forward(
            x, pe, index=None, training=True, dropout_p=p, seed=123
        )
        out_tr = jax.block_until_ready(out_tr)
        assert out_tr.shape == (B, N, L_P, d)
        # Every output element is either 0 (dropped) or ref / (1 - p) (kept).
        scaled_ref = ref / (1.0 - p)
        is_zero = jnp.isclose(out_tr, 0.0, atol=1e-6)
        is_kept = jnp.isclose(out_tr, scaled_ref, atol=1e-5, rtol=1e-5)
        assert bool(jnp.all(is_zero | is_kept)), f"dropout structure mismatch p={p}"

    print("KERNEL_OK")
</pallas_src>

<mosaic_0001>
module attributes {stable_mosaic.version = 11 : i64} {
  func.func @kernel(%arg0: i32, %arg1: i32, %arg2: memref<8x256xf32, #tpu.memory_space<vmem>>, %arg3: memref<1x256xf32, #tpu.memory_space<vmem>>, %arg4: memref<8x256xf32, #tpu.memory_space<vmem>>) attributes {dimension_semantics = [#tpu.dimension_semantics<parallel>, #tpu.dimension_semantics<parallel>], iteration_bounds = array<i64: 1, 1>, scalar_prefetch = 0 : i64, scratch_operands = 0 : i64, tpu.core_type = #tpu.core_type<tc>, window_params = [{transform_indices = @transform_0, window_bounds = array<i64: 8, 256>}, {transform_indices = @transform_1, window_bounds = array<i64: 1, 256>}, {transform_indices = @transform_2, window_bounds = array<i64: 8, 256>}]} {
    %c0 = arith.constant 0 : index
    %c0_0 = arith.constant 0 : index
    %0 = vector.load %arg2[%c0, %c0_0] : memref<8x256xf32, #tpu.memory_space<vmem>>, vector<8x256xf32>
    %c0_1 = arith.constant 0 : index
    %c0_2 = arith.constant 0 : index
    %1 = vector.load %arg3[%c0_1, %c0_2] : memref<1x256xf32, #tpu.memory_space<vmem>>, vector<1x256xf32>
    %2 = vector.broadcast %1 : vector<1x256xf32> to vector<8x256xf32>
    %3 = arith.addf %0, %2 : vector<8x256xf32>
    %c0_3 = arith.constant 0 : index
    %c0_4 = arith.constant 0 : index
    %4 = vector.load %arg4[%c0_3, %c0_4] : memref<8x256xf32, #tpu.memory_space<vmem>>, vector<8x256xf32>
    tpu.vector_store %arg4[%c0_3, %c0_4], %3 {strides = array<i32>} : memref<8x256xf32, #tpu.memory_space<vmem>>, vector<8x256xf32>,
    return
  }
  func.func @transform_0(%arg0: i32, %arg1: i32) -> (i32, i32) {
    %c0_i32 = arith.constant 0 : i32
    return %arg0, %arg1 : i32, i32
  }
  func.func @transform_1(%arg0: i32, %arg1: i32) -> (i32, i32) {
    %c0_i32 = arith.constant 0 : i32
    %c0_i32_0 = arith.constant 0 : i32
    return %c0_i32, %arg1 : i32, i32
  }
  func.func @transform_2(%arg0: i32, %arg1: i32) -> (i32, i32) {
    %c0_i32 = arith.constant 0 : i32
    return %arg0, %arg1 : i32, i32
  }
}

</mosaic_0001>

<bundles_post_ra>
// kernel: positional_encoding_forward.1
= control target key start
LH: loop header
LB: loop body
LE: loop exit
PB: predicated region body
PF: predicated region fallthrough
CT: control target
= control target key end

     0   :  { %v15_v0 = vlaneseq  ;;  %s63_s1 = inlined_call_operand.vmem [shape: f32[1,256], index: 1, kind: input, shape index: {}]   ;;  %s64_s0 = inlined_call_operand.vmem [shape: f32[8,256], index: 0, kind: input, shape index: {}]   ;;  %s65_s2 = inlined_call_operand.vmem [shape: f32[8,256], index: 2, kind: output, shape index: {}]  }
   0x1   :  { %v13_v2 = vld [vmem:[%s63_s1] sm:$0x3]  ;;  %v12_v6 = vld [vmem:[%s64_s0 + $0x8] sm:$0xff] }
   0x2   :  { %v16_v1 = vshrl.u32 %v15_v0, 7  ;;  %v11_v5 = vld [vmem:[%s64_s0] sm:$0xff] }
   0x4   :  { %v17_v3 = vsub.s32 0, %v16_v1  ;;  %v21_v4 = vsub.s32 1, %v16_v1 }
   0x6   :  { %v18_v7 = vrot.slane %v13_v2, %v17_v3  ;;  %v22_v8 = vrot.slane %v13_v2, %v21_v4 }
   0x8   :  { %v25_v9 = vadd.f32 %v18_v7, %v11_v5  ;;  %v26_v10 = vadd.f32 %v22_v8, %v12_v6 }
   0xa   :  { %27 = vst [vmem:[%s65_s2] sm:$0xff] %v25_v9  ;;  %28 = vst [vmem:[%s65_s2 + $0x8] sm:$0xff] %v26_v10 }

</bundles_post_ra>
